<compile_context>
chip_gen: v6e
topology: v6e:2x2x1
jax: 0.10.0
libtpu: 0.0.40
codegen_flags: <defaults>
</compile_context>

<pallas_src>
import math
import functools

import jax
import jax.numpy as jnp
from jax.experimental import pallas as pl
from jax.experimental.pallas import tpu as pltpu


def _round_up(x: int, m: int) -> int:
    return (x + m - 1) // m * m


def _make_lossmix_kernel(nonlin: str):
    def lossmix_kernel(x_ref, w1_ref, b1_ref, w3_ref, o_ref, acc_ref):
        # x_ref  : (B, TK)     compute dtype (bf16/f32), VMEM   -- D-tile of activations
        # w1_ref : (TK, 128)   compute dtype,            VMEM   -- D-tile of fc1 weight (transposed)
        # b1_ref : (1, 128)    f32, VMEM                        -- fc1 bias (resident)
        # w3_ref : (1, 128)    f32, VMEM                        -- fc3 weight row (resident)
        # o_ref  : (1, 1)      f32, VMEM                        -- scalar mean, written on last step
        # acc_ref: (B, 128)    f32, VMEM scratch accumulator
        k = pl.program_id(0)

        @pl.when(k == 0)
        def _init():
            acc_ref[...] = jnp.zeros_like(acc_ref)

        # fc1 partial product on the MXU, f32 accumulation.
        acc_ref[...] += jnp.dot(
            x_ref[...], w1_ref[...], preferred_element_type=jnp.float32
        )

        @pl.when(k == pl.num_programs(0) - 1)
        def _finalize():
            h1 = acc_ref[...] + b1_ref[...]            # (B, 128), broadcast bias
            if nonlin == "relu":
                h1 = jnp.maximum(h1, 0.0)
            else:  # leakyrelu, slope 0.01 (PyTorch default)
                h1 = jnp.where(h1 > 0.0, h1, 0.01 * h1)
            # fc3 (output dim 1) as a lane reduction, then mean over rows.
            q = jnp.sum(h1 * w3_ref[...], axis=-1, keepdims=True)   # (B, 1)
            o_ref[...] = jnp.sum(q, axis=0, keepdims=True) * (1.0 / q.shape[0])

    return lossmix_kernel


@functools.partial(jax.jit, static_argnames=("nonlin", "tk", "compute_dtype"))
def loss_mix_forward(h, w1, b1, w3, b3, *, nonlin="relu", tk=2048,
                     compute_dtype=jnp.bfloat16):
    """Pallas implementation of LossMix.forward.

    h  : (B, C, H, W) or (B, D) array
    w1 : (D, 128)  (PyTorch fc1.weight.T)
    b1 : (128,)
    w3 : (128,)    (PyTorch fc3.weight[0])
    b3 : ()
    returns: scalar float32
    """
    if nonlin not in ("relu", "leakyrelu"):
        raise ValueError(f"unknown nonlin: {nonlin}")

    B = h.shape[0]
    x = h.reshape(B, -1)                     # == torch .view(B, -1)
    D = x.shape[1]
    assert w1.shape == (D, 128), (w1.shape, D)

    # Contraction tile: multiple of 128, never larger than needed, capped so
    # two double-buffered input tiles stay far under scoped-VMEM defaults.
    tk = max(128, _round_up(min(tk, _round_up(D, 128)), 128))
    d_pad = _round_up(D, tk)
    if d_pad != D:
        # Zero-padding the contraction dim is exact for x @ w1.
        x = jnp.pad(x, ((0, 0), (0, d_pad - D)))
        w1 = jnp.pad(w1, ((0, d_pad - D), (0, 0)))

    x = x.astype(compute_dtype)
    w1 = w1.astype(compute_dtype)
    b1_2d = b1.reshape(1, 128).astype(jnp.float32)
    w3_2d = w3.reshape(1, 128).astype(jnp.float32)

    itemsize = jnp.dtype(compute_dtype).itemsize
    # 2x double-buffered input tiles + small f32 operands/scratch + headroom.
    vmem_need = 2 * (B * tk + tk * 128) * itemsize + (B + 3) * 128 * 4
    vmem_limit = int(min(32 << 20, max(2 * vmem_need, 4 << 20)))

    n_k = d_pad // tk
    cost = pl.CostEstimate(
        flops=2 * B * d_pad * 128 + 3 * B * 128,
        transcendentals=0,
        bytes_accessed=itemsize * (B * d_pad + d_pad * 128) + 4 * (2 * 128 + 1),
    )

    kernel = _make_lossmix_kernel(nonlin)

    out = pl.pallas_call(
        kernel,
        out_shape=jax.ShapeDtypeStruct((1, 1), jnp.float32),
        grid_spec=pltpu.PrefetchScalarGridSpec(
            num_scalar_prefetch=0,
            grid=(n_k,),
            in_specs=[
                pl.BlockSpec((B, tk), lambda k: (0, k)),     # x D-tile
                pl.BlockSpec((tk, 128), lambda k: (k, 0)),   # fc1 weight D-tile
                pl.BlockSpec((1, 128), lambda k: (0, 0)),    # fc1 bias (resident)
                pl.BlockSpec((1, 128), lambda k: (0, 0)),    # fc3 weight row (resident)
            ],
            out_specs=pl.BlockSpec((1, 1), lambda k: (0, 0)),
            scratch_shapes=[pltpu.VMEM((B, 128), jnp.float32)],
        ),
        compiler_params=pltpu.CompilerParams(
            dimension_semantics=("arbitrary",),   # reduction axis
            vmem_limit_bytes=vmem_limit,
        ),
        cost_estimate=cost,
    )(x, w1, b1_2d, w3_2d)

    # mean(q + b3) == mean(q) + b3 -> fold fc3 bias outside the kernel.
    return out[0, 0] + jnp.asarray(b3, jnp.float32)


def init_lossmix_params(key, num_out):
    """Deterministic init matching nn.Linear's default (uniform +-1/sqrt(fan_in))."""
    k1, k2, k3, k4 = jax.random.split(key, 4)
    bound1 = 1.0 / math.sqrt(num_out)
    w1 = jax.random.uniform(k1, (num_out, 128), jnp.float32, -bound1, bound1)
    b1 = jax.random.uniform(k2, (128,), jnp.float32, -bound1, bound1)
    bound3 = 1.0 / math.sqrt(128)
    w3 = jax.random.uniform(k3, (128,), jnp.float32, -bound3, bound3)
    b3 = jax.random.uniform(k4, (), jnp.float32, -bound3, bound3)
    return w1, b1, w3, b3


def loss_mix_reference(h, w1, b1, w3, b3, nonlin="relu"):
    """Pure-JAX f32 reference for verification."""
    B = h.shape[0]
    x = h.reshape(B, -1).astype(jnp.float32)
    h1 = x @ w1 + b1
    if nonlin == "relu":
        h1 = jnp.maximum(h1, 0.0)
    else:
        h1 = jnp.where(h1 > 0.0, h1, 0.01 * h1)
    q = h1 @ w3.reshape(128, 1) + b3
    return jnp.mean(q)


if __name__ == "__main__":
    key = jax.random.PRNGKey(0)
    k_h, k_p = jax.random.split(key)

    # Small NCHW activation: batch=2, channels=4, spatial=16x16 -> num_out=1024
    B, C, H, W = 2, 4, 16, 16
    num_out = C * H * W
    h = jax.random.normal(k_h, (B, C, H, W), jnp.float32)

    w1, b1, w3, b3 = init_lossmix_params(k_p, num_out)
    ref = loss_mix_reference(h, w1, b1, w3, b3, nonlin="relu")

    # f32 path (tight check). tk=512 -> grid of 2 reduction steps, exercising
    # accumulation + pl.when finalize.
    out_f32 = loss_mix_forward(h, w1, b1, w3, b3, nonlin="relu",
                               tk=512, compute_dtype=jnp.float32)
    out_f32 = jax.block_until_ready(out_f32)
    assert jnp.allclose(out_f32, ref, rtol=1e-5, atol=1e-5), (out_f32, ref)

    # leakyrelu branch (f32, tight check).
    out_lrelu = loss_mix_forward(h, w1, b1, w3, b3, nonlin="leakyrelu",
                                 tk=512, compute_dtype=jnp.float32)
    out_lrelu = jax.block_until_ready(out_lrelu)
    ref_lrelu = loss_mix_reference(h, w1, b1, w3, b3, nonlin="leakyrelu")
    assert jnp.allclose(out_lrelu, ref_lrelu, rtol=1e-5, atol=1e-5), (out_lrelu, ref_lrelu)

    # bf16-streamed path (default, halves HBM bytes) -- looser tolerance.
    out_bf16 = loss_mix_forward(h, w1, b1, w3, b3, nonlin="relu",
                                compute_dtype=jnp.bfloat16)
    out_bf16 = jax.block_until_ready(out_bf16)
    assert jnp.allclose(out_bf16, ref, rtol=5e-2, atol=5e-2), (out_bf16, ref)

    print("KERNEL_OK")
</pallas_src>

<mosaic_0001>
module attributes {stable_mosaic.version = 11 : i64} {
  func.func @lossmix_kernel(%arg0: i32, %arg1: memref<2x512xf32, #tpu.memory_space<vmem>>, %arg2: memref<512x128xf32, #tpu.memory_space<vmem>>, %arg3: memref<1x128xf32, #tpu.memory_space<vmem>>, %arg4: memref<1x128xf32, #tpu.memory_space<vmem>>, %arg5: memref<1x1xf32, #tpu.memory_space<vmem>>, %arg6: memref<2x128xf32, #tpu.memory_space<vmem>>) attributes {dimension_semantics = [#tpu.dimension_semantics<arbitrary>], iteration_bounds = array<i64: 2>, scalar_prefetch = 0 : i64, scratch_operands = 1 : i64, tpu.core_type = #tpu.core_type<tc>, window_params = [{transform_indices = @transform_0, window_bounds = array<i64: 2, 512>}, {transform_indices = @transform_1, window_bounds = array<i64: 512, 128>}, {pipeline_mode = #tpu.pipeline_mode<synchronous>, transform_indices = @transform_2, window_bounds = array<i64: 1, 128>}, {pipeline_mode = #tpu.pipeline_mode<synchronous>, transform_indices = @transform_3, window_bounds = array<i64: 1, 128>}, {pipeline_mode = #tpu.pipeline_mode<synchronous>, transform_indices = @transform_4, window_bounds = array<i64: 1, 1>}]} {
    %c0_i32 = arith.constant 0 : i32
    %0 = arith.cmpi eq, %arg0, %c0_i32 : i32
    %1 = arith.extui %0 : i1 to i32
    %c0_i32_0 = arith.constant 0 : i32
    %2 = arith.cmpi ne, %1, %c0_i32_0 : i32
    scf.if %2 {
      %cst_9 = arith.constant 0.000000e+00 : f32
      %12 = vector.broadcast %cst_9 : f32 to vector<2x128xf32>
      %c0_10 = arith.constant 0 : index
      %c0_11 = arith.constant 0 : index
      %13 = vector.load %arg6[%c0_10, %c0_11] : memref<2x128xf32, #tpu.memory_space<vmem>>, vector<2x128xf32>
      tpu.vector_store %arg6[%c0_10, %c0_11], %12 {strides = array<i32>} : memref<2x128xf32, #tpu.memory_space<vmem>>, vector<2x128xf32>,
    } else {
    }
    %c0 = arith.constant 0 : index
    %c0_1 = arith.constant 0 : index
    %3 = vector.load %arg6[%c0, %c0_1] : memref<2x128xf32, #tpu.memory_space<vmem>>, vector<2x128xf32>
    %c0_2 = arith.constant 0 : index
    %c0_3 = arith.constant 0 : index
    %4 = vector.load %arg1[%c0_2, %c0_3] : memref<2x512xf32, #tpu.memory_space<vmem>>, vector<2x512xf32>
    %c0_4 = arith.constant 0 : index
    %c0_5 = arith.constant 0 : index
    %5 = vector.load %arg2[%c0_4, %c0_5] : memref<512x128xf32, #tpu.memory_space<vmem>>, vector<512x128xf32>
    %cst = arith.constant dense<0.000000e+00> : vector<2x128xf32>
    %6 = tpu.matmul %4, %5, %cst {dimension_numbers = #tpu.dot_dimension_numbers<[1], [0], [0], [1], [0, 0, 1, 1], [], []>} : vector<2x512xf32>, vector<512x128xf32>, vector<2x128xf32> -> vector<2x128xf32>
    %7 = arith.addf %3, %6 : vector<2x128xf32>
    %c0_6 = arith.constant 0 : index
    %c0_7 = arith.constant 0 : index
    %8 = vector.load %arg6[%c0_6, %c0_7] : memref<2x128xf32, #tpu.memory_space<vmem>>, vector<2x128xf32>
    tpu.vector_store %arg6[%c0_6, %c0_7], %7 {strides = array<i32>} : memref<2x128xf32, #tpu.memory_space<vmem>>, vector<2x128xf32>,
    %c1_i32 = arith.constant 1 : i32
    %9 = arith.cmpi eq, %arg0, %c1_i32 : i32
    %10 = arith.extui %9 : i1 to i32
    %c0_i32_8 = arith.constant 0 : i32
    %11 = arith.cmpi ne, %10, %c0_i32_8 : i32
    scf.if %11 {
      %c0_9 = arith.constant 0 : index
      %c0_10 = arith.constant 0 : index
      %12 = vector.load %arg6[%c0_9, %c0_10] : memref<2x128xf32, #tpu.memory_space<vmem>>, vector<2x128xf32>
      %c0_11 = arith.constant 0 : index
      %c0_12 = arith.constant 0 : index
      %13 = vector.load %arg3[%c0_11, %c0_12] : memref<1x128xf32, #tpu.memory_space<vmem>>, vector<1x128xf32>
      %14 = vector.broadcast %13 : vector<1x128xf32> to vector<2x128xf32>
      %15 = arith.addf %12, %14 : vector<2x128xf32>
      %cst_13 = arith.constant 0.000000e+00 : f32
      %16 = vector.broadcast %cst_13 : f32 to vector<2x128xf32>
      %17 = arith.maximumf %15, %16 : vector<2x128xf32>
      %c0_14 = arith.constant 0 : index
      %c0_15 = arith.constant 0 : index
      %18 = vector.load %arg4[%c0_14, %c0_15] : memref<1x128xf32, #tpu.memory_space<vmem>>, vector<1x128xf32>
      %19 = vector.broadcast %18 : vector<1x128xf32> to vector<2x128xf32>
      %20 = arith.mulf %17, %19 : vector<2x128xf32>
      %cst_16 = arith.constant dense<0.000000e+00> : vector<2xf32>
      %21 = vector.multi_reduction <add>, %20, %cst_16 [1] : vector<2x128xf32> to vector<2xf32>
      %22 = vector.shape_cast %21 : vector<2xf32> to vector<2x1xf32>
      %cst_17 = arith.constant dense<0.000000e+00> : vector<1xf32>
      %23 = vector.multi_reduction <add>, %22, %cst_17 [0] : vector<2x1xf32> to vector<1xf32>
      %24 = vector.shape_cast %23 : vector<1xf32> to vector<1x1xf32>
      %cst_18 = arith.constant 5.000000e-01 : f32
      %25 = vector.broadcast %cst_18 : f32 to vector<1x1xf32>
      %26 = arith.mulf %24, %25 : vector<1x1xf32>
      %c0_19 = arith.constant 0 : index
      %c0_20 = arith.constant 0 : index
      %27 = vector.load %arg5[%c0_19, %c0_20] : memref<1x1xf32, #tpu.memory_space<vmem>>, vector<1x1xf32>
      tpu.vector_store %arg5[%c0_19, %c0_20], %26 {strides = array<i32>} : memref<1x1xf32, #tpu.memory_space<vmem>>, vector<1x1xf32>,
    } else {
    }
    return
  }
  func.func @transform_0(%arg0: i32) -> (i32, i32) {
    %c0_i32 = arith.constant 0 : i32
    %c0_i32_0 = arith.constant 0 : i32
    return %c0_i32, %arg0 : i32, i32
  }
  func.func @transform_1(%arg0: i32) -> (i32, i32) {
    %c0_i32 = arith.constant 0 : i32
    %c0_i32_0 = arith.constant 0 : i32
    return %arg0, %c0_i32 : i32, i32
  }
  func.func @transform_2(%arg0: i32) -> (i32, i32) {
    %c0_i32 = arith.constant 0 : i32
    %c0_i32_0 = arith.constant 0 : i32
    %c0_i32_1 = arith.constant 0 : i32
    return %c0_i32, %c0_i32_0 : i32, i32
  }
  func.func @transform_3(%arg0: i32) -> (i32, i32) {
    %c0_i32 = arith.constant 0 : i32
    %c0_i32_0 = arith.constant 0 : i32
    %c0_i32_1 = arith.constant 0 : i32
    return %c0_i32, %c0_i32_0 : i32, i32
  }
  func.func @transform_4(%arg0: i32) -> (i32, i32) {
    %c0_i32 = arith.constant 0 : i32
    %c0_i32_0 = arith.constant 0 : i32
    %c0_i32_1 = arith.constant 0 : i32
    return %c0_i32, %c0_i32_0 : i32, i32
  }
}

</mosaic_0001>

<bundles_post_ra>
// kernel: loss_mix_forward.1
= control target key start
LH: loop header
LB: loop body
LE: loop exit
PB: predicated region body
PF: predicated region fallthrough
CT: control target
= control target key end

     0   :  { %9 = vsyncpa [#allocation4], 0  ;;  %s1019_s0 = inlined_call_operand.vmem [shape: f32[2,1024], index: 0, kind: input, shape index: {}]   ;;  %s1020_s1 = inlined_call_operand.hbm [shape: f32[1024,128], index: 1, kind: input, shape index: {}]   ;;  %s1021_s2 = inlined_call_operand.vmem [shape: f32[1,128], index: 2, kind: input, shape index: {}]   ;;  %s1022_s3 = inlined_call_operand.vmem [shape: f32[1,128], index: 3, kind: input, shape index: {}]   ;;  %s1023_s4 = inlined_call_operand.hbm [shape: f32[1,1], index: 4, kind: output, shape index: {}]  }
   0x1   :  { %11 = vsyncpa [#allocation4 + $0x1], 0 }
   0x2   :  { %12 = vsyncpa [#allocation5], 0  ;;  %s830_s15 = smov 0   ;;  %s832_s16 = smov 0  }
   0x3   :  { %s834_s17 = smov 0   ;;  %s836_s18 = smov 0  }
   0x4 LB: > { %s849_s19 = sadd.s32 4294967295, %s797_s18   ;;  %s852_s20 = sadd.s32 1, %s797_s18   ;;  %s797_s18 = sphi %s836_s18, %s1032_s18   ;;  %s793_s17 = sphi %s834_s17, %s1031_s17   ;;  %s789_s16 = sphi %s832_s16, %s1030_s16   ;;  %s785_s15 = sphi %s830_s15, %s1029_s15  }
   0x5   : > { %s48_s21 = ssub.s32 %s797_s18, %s852_s20  ;;  %s51_s22 = sadd.s32 1, %s793_s17 }
   0x6   : > { %p49_p0 = scmp.eq.s32.totalorder %s48_s21, 0  ;;  %p58_p1 = scmp.ne.s32.totalorder %s793_s17, %s789_s16 }
   0x7   : > { %p59_p2 = scmp.eq.s32.totalorder %s797_s18, 0  ;;  %p64_p3 = scmp.ne.s32.totalorder %s789_s16, %s785_s15 }
   0x8   : > { %s862_s23 = scalar_select %p49_p0, %s793_s17, %s51_s22  }
   0x9   : > { %p60_p4 = por %p59_p2, %p58_p1  ;;  %p65_p5 = scmp.eq.s32.totalorder %s849_s19, 0 }
   0xa   : > { %p666_p6 = scmp.lt.s32.totalorder %s797_s18, 2  ;;  %s166_s25 = sand.u32 1, %s793_s17  }
   0xb   : > { %p866_p7 = por %p65_p5, %p64_p3  ;;  %s570_s26 = sshll.u32 %s166_s25, 9 }
   0xc   : > { %s585_s27 = sshll.u32 %s797_s18, 13  ;;  %s170_s5 = scalar_lea.vmem [#allocation3], %s570_s26 }
   0xd   : > { %s1025_s24 = scalar_select %p866_p7, 1, 0 }
   0xe   : > { %s875_s30 = scalar_lea.hbm %s1020_s1, %s585_s27  ;;  %s177_s6 = sshll.u32 %s170_s5, 4  ;;  %s877_s6 = int_to_ptr.vmem [resolvable:$true] %s177_s6 }
   0xf   : > { %p879_p8 = pnand %p666_p6, %p60_p4  ;;  %s884_s8 = scalar_lea.sflag [#allocation4], %s166_s25 }
  0x10   : > { %s707_s9 = scalar_lea.hbm %s875_s30, 8192  ;;  %s712_s12 = scalar_lea.hbm %s1020_s1, 16384 }
  0x11   : > { %p708_p10 = scmp.ne.s32.totalorder %s875_s30, %s707_s9  ;;  %p709_p11 = pneg %p879_p8 }
  0x12   : > { %p713_p0 = scmp.lt.s32.totalorder %s875_s30, %s1020_s1  ;;  %p714_p1 = scmp.lt.s32.totalorder %s712_s12, %s707_s9 }
  0x13   : > { %p710_p12 = pnand %p709_p11, %p708_p10 }
  0x14   : > { %p715_p2 = por %p714_p1, %p713_p0 }
  0x15   : > { %p711_p13 = pneg %p710_p12 }
  0x17   : > { %p716_p3 = pnand %p715_p2, %p711_p13 }
  0x19   : > { %719 = shalt.err (!%p716_p3)
}
  0x1a   : > { %s720_s15 = scalar_lea.vmem %s877_s6, 8192  ;;  %s799_s21 = smov [#allocation3]  }
  0x1b   : > { %p721_p4 = scmp.ne.s32.totalorder %s877_s6, %s720_s15  ;;  %s725_s22 = sshll.u32 %s799_s21, 4  ;;  %s726_s22 = int_to_ptr.vmem [resolvable:$false] %s725_s22 }
  0x1c   : > { %s727_s25 = scalar_lea.vmem %s726_s22, 16384  ;;  %p728_p10 = scmp.lt.s32.totalorder %s877_s6, %s726_s22 }
  0x1d   : > { %p723_p5 = pnand %p721_p4, %p709_p11  ;;  %p729_p12 = scmp.lt.s32.totalorder %s727_s25, %s720_s15 }
  0x1f   : > { %p724_p6 = pneg %p723_p5  ;;  %p730_p9 = por %p729_p12, %p728_p10 }
  0x21   : > { %p731_p7 = pnand %p730_p9, %p724_p6 }
  0x23   : > { %734 = shalt.err (!%p731_p7)
}
  0x24   : > { %s800_s26 = smov 128   ;;  %s801_s27 = smov 8  }
  0x25   : > { %665 = dma.hbm_to_vmem [thread:$0]  (!%p879_p8), %s875_s30, 8192, %s877_s6, %s884_s8, %s800_s26, %s800_s26, %s801_s27  }
  0x26   : > { %p185_p11 = scmp.lt.s32.totalorder %s797_s18, 3  ;;  %p1027_p13 = scmp.ge.s32.totalorder %s797_s18, 1 }
  0x28   : > { %p186_p0 = pnand %p1027_p13, %p185_p11 }
  0x29   : > { %s191_s28 = sand.u32 (!%p186_p0), 1, %s789_s16   ;;  %p1028_p7 = scmp.ne.s32.totalorder (!%p186_p0), %s1025_s24, 0 }
  0x2a   : > { %189 = sbr.rel (%p186_p0) target bundleno = 478 (0x1de), region = 36  ;;  %s574_s29 = sshll.u32 (!%p186_p0), %s191_s28, 9 }
  0x2b   : > { %s192_s5 = scalar_lea.sflag (!%p186_p0), [#allocation4], %s191_s28  ;;  %s909_s9 = scalar_lea.vmem (!%p186_p0), [#allocation3], %s574_s29 }
  0x2f   : > { %776 = dma.done.wait (%p1028_p7), %s192_s5, 8192  }
  0x30   : > { %778 = vsyncadd (%p1028_p7), %s192_s5, 4294959104  ;;  %s575_s10 = sshll.u32 %s849_s19, 2  ;;  %p577_p8 = scmp.ne.s32.totalorder %s849_s19, 0 }
  0x31   : > { %p221_p9 = scmp.lt.s32.totalorder %s575_s10, 7 }
  0x32   : > { %230 = sbr.rel (%p577_p8) target bundleno = 57 (0x39), region = 44 }
  0x33   : > { %s1034_s10 = smov (!%p221_p9, %s575_s10), 7 }
  0x34   : > { %s576_s30 = sshll.u32 %s1034_s10, 1 }
  0x35   : > { %s919_s7 = scalar_lea.vmem %s1019_s0, %s576_s30 }
  0x37   : > { %v802_v0 = vmov 0.0  }
  0x38   : > { %231 = vst [vmem:[#allocation2] sm:$0x3] %v802_v0 }
  0x39 PF: > { %v265_v1 = vld [vmem:[%s909_s9 + $0xf8] sm:$0xff]  ;;  %v264_v5 = vld [vmem:[%s909_s9 + $0xf0] sm:$0xff]  ;;  %v263_v9 = vld [vmem:[%s909_s9 + $0xe8] sm:$0xff]  ;;  %v803_v31 = vmov 1983009808   ;;  %v303_v33 = vlaneseq  ;;  %p578_p1 = scmp.ne.s32.totalorder %s849_s19, 1 }
  0x3a   : > { %v297_v2 = vld [vmem:[%s909_s9 + $0x1f8] sm:$0xff]  ;;  %586 = vmatprep.subr.mxu0 %v265_v1  ;;  %v296_v6 = vld [vmem:[%s909_s9 + $0x1f0] sm:$0xff]  ;;  %v295_v10 = vld [vmem:[%s909_s9 + $0x1e8] sm:$0xff]  ;;  %v301_v32 = vunpack.c.l.s4 %v803_v31 }
  0x3b   : > { %v249_v3 = vld [vmem:[%s909_s9 + $0x78] sm:$0xff]  ;;  %621 = vmatprep.subr.mxu1 %v297_v2  ;;  %v248_v7 = vld [vmem:[%s909_s9 + $0x70] sm:$0xff]  ;;  %v247_v11 = vld [vmem:[%s909_s9 + $0x68] sm:$0xff]  ;;  %v304_v43 = vshrl.u32 %v303_v33, 7 }
  0x3c   : > { %v281_v4 = vld [vmem:[%s909_s9 + $0x178] sm:$0xff]  ;;  %587 = vmatpush3.msra.mxu0 %v249_v3  ;;  %v280_v8 = vld [vmem:[%s909_s9 + $0x170] sm:$0xff]  ;;  %v279_v12 = vld [vmem:[%s909_s9 + $0x168] sm:$0xff]  ;;  %v302_v42 = vunpack.c.0.s8 %v301_v32 }
  0x3d   : > { %622 = vmatpush3.msra.mxu1 %v281_v4  ;;  %588 = vmatprep.subr.mxu0 %v264_v5  ;;  %v262_v13 = vld [vmem:[%s909_s9 + $0xe0] sm:$0xff]  ;;  %v261_v17 = vld [vmem:[%s909_s9 + $0xd8] sm:$0xff]  ;;  %v260_v21 = vld [vmem:[%s909_s9 + $0xd0] sm:$0xff] }
  0x3e   : > { %623 = vmatprep.subr.mxu1 %v296_v6  ;;  %589 = vmatpush3.msra.mxu0 %v248_v7  ;;  %v294_v14 = vld [vmem:[%s909_s9 + $0x1e0] sm:$0xff]  ;;  %v293_v18 = vld [vmem:[%s909_s9 + $0x1d8] sm:$0xff]  ;;  %v292_v22 = vld [vmem:[%s909_s9 + $0x1d0] sm:$0xff]  ;;  %v305_v52 = vsub.s32 %v302_v42, %v304_v43 }
  0x3f   : > { %624 = vmatpush3.msra.mxu1 %v280_v8  ;;  %590 = vmatprep.subr.mxu0 %v263_v9  ;;  %v246_v15 = vld [vmem:[%s909_s9 + $0x60] sm:$0xff]  ;;  %v245_v19 = vld [vmem:[%s909_s9 + $0x58] sm:$0xff]  ;;  %v244_v23 = vld [vmem:[%s909_s9 + $0x50] sm:$0xff] }
  0x40   : > { %625 = vmatprep.subr.mxu1 %v295_v10  ;;  %v278_v16 = vld [vmem:[%s909_s9 + $0x160] sm:$0xff]  ;;  %591 = vmatpush3.msra.mxu0 %v247_v11  ;;  %v277_v20 = vld [vmem:[%s909_s9 + $0x158] sm:$0xff]  ;;  %v276_v24 = vld [vmem:[%s909_s9 + $0x150] sm:$0xff] }
  0x41   : > { %626 = vmatpush3.msra.mxu1 %v279_v12  ;;  %592 = vmatprep.subr.mxu0 %v262_v13  ;;  %v259_v25 = vld [vmem:[%s909_s9 + $0xc8] sm:$0xff]  ;;  %v258_v29 = vld [vmem:[%s909_s9 + $0xc0] sm:$0xff]  ;;  %v257_v36 = vld [vmem:[%s909_s9 + $0xb8] sm:$0xff] }
  0x42   : > { %627 = vmatprep.subr.mxu1 %v294_v14  ;;  %593 = vmatpush3.msra.mxu0 %v246_v15  ;;  %v291_v26 = vld [vmem:[%s909_s9 + $0x1c8] sm:$0xff]  ;;  %v290_v30 = vld [vmem:[%s909_s9 + $0x1c0] sm:$0xff]  ;;  %v289_v37 = vld [vmem:[%s909_s9 + $0x1b8] sm:$0xff] }
  0x43   : > { %628 = vmatpush3.msra.mxu1 %v278_v16  ;;  %594 = vmatprep.subr.mxu0 %v261_v17  ;;  %v243_v27 = vld [vmem:[%s909_s9 + $0x48] sm:$0xff]  ;;  %v242_v34 = vld [vmem:[%s909_s9 + $0x40] sm:$0xff]  ;;  %v241_v38 = vld [vmem:[%s909_s9 + $0x38] sm:$0xff] }
  0x44   : > { %629 = vmatprep.subr.mxu1 %v293_v18  ;;  %595 = vmatpush3.msra.mxu0 %v245_v19  ;;  %v275_v28 = vld [vmem:[%s909_s9 + $0x148] sm:$0xff]  ;;  %v274_v35 = vld [vmem:[%s909_s9 + $0x140] sm:$0xff]  ;;  %v273_v39 = vld [vmem:[%s909_s9 + $0x138] sm:$0xff] }
  0x45   : > { %630 = vmatpush3.msra.mxu1 %v277_v20  ;;  %596 = vmatprep.subr.mxu0 %v260_v21  ;;  %v256_v40 = vld [vmem:[%s909_s9 + $0xb0] sm:$0xff]  ;;  %v255_v46 = vld [vmem:[%s909_s9 + $0xa8] sm:$0xff]  ;;  %v254_v50 = vld [vmem:[%s909_s9 + $0xa0] sm:$0xff] }
  0x46   : > { %631 = vmatprep.subr.mxu1 %v292_v22  ;;  %597 = vmatpush3.msra.mxu0 %v244_v23  ;;  %v288_v41 = vld [vmem:[%s909_s9 + $0x1b0] sm:$0xff]  ;;  %v287_v47 = vld [vmem:[%s909_s9 + $0x1a8] sm:$0xff]  ;;  %v286_v51 = vld [vmem:[%s909_s9 + $0x1a0] sm:$0xff] }
  0x47   : > { %632 = vmatpush3.msra.mxu1 %v276_v24  ;;  %598 = vmatprep.subr.mxu0 %v259_v25  ;;  %v240_v44 = vld [vmem:[%s909_s9 + $0x30] sm:$0xff]  ;;  %v239_v48 = vld [vmem:[%s909_s9 + $0x28] sm:$0xff]  ;;  %v238_v53 = vld [vmem:[%s909_s9 + $0x20] sm:$0xff] }
  0x48   : > { %633 = vmatprep.subr.mxu1 %v291_v26  ;;  %599 = vmatpush3.msra.mxu0 %v243_v27  ;;  %v272_v45 = vld [vmem:[%s909_s9 + $0x130] sm:$0xff]  ;;  %v271_v49 = vld [vmem:[%s909_s9 + $0x128] sm:$0xff]  ;;  %v270_v54 = vld [vmem:[%s909_s9 + $0x120] sm:$0xff] }
  0x49   : > { %634 = vmatpush3.msra.mxu1 %v275_v28  ;;  %600 = vmatprep.subr.mxu0 %v258_v29  ;;  %v233_v55 = vld [vmem:[%s919_s7] sm:$0xff]  ;;  %v252_v61 = vld [vmem:[%s909_s9 + $0x90] sm:$0xff]  ;;  %v251_v3 = vld [vmem:[%s909_s9 + $0x88] sm:$0xff] }
  0x4a   : > { %635 = vmatprep.subr.mxu1 %v290_v30  ;;  %601 = vmatpush3.msra.mxu0 %v242_v34  ;;  %v253_v56 = vld [vmem:[%s909_s9 + $0x98] sm:$0xff]  ;;  %v299_v58 = vcombine.high %v233_v55, %v233_v55  ;;  %v284_v62 = vld [vmem:[%s909_s9 + $0x190] sm:$0xff]  ;;  %v306_v63 = vrot.slane %v233_v55, %v305_v52  ;;  %v283_v4 = vld [vmem:[%s909_s9 + $0x188] sm:$0xff] }
  0x4b   : > { %636 = vmatpush3.msra.mxu1 %v274_v35  ;;  %602 = vmatprep.subr.mxu0 %v257_v36  ;;  %v285_v57 = vld [vmem:[%s909_s9 + $0x198] sm:$0xff]  ;;  %v236_v0 = vld [vmem:[%s909_s9 + $0x10] sm:$0xff]  ;;  %v235_v5 = vld [vmem:[%s909_s9 + $0x8] sm:$0xff] }
  0x4c   : > { %637 = vmatprep.subr.mxu1 %v289_v37  ;;  %603 = vmatpush3.msra.mxu0 %v241_v38  ;;  %v237_v59 = vld [vmem:[%s909_s9 + $0x18] sm:$0xff]  ;;  %v268_v1 = vld [vmem:[%s909_s9 + $0x110] sm:$0xff]  ;;  %v313_v2 = vrot.slane %v299_v58, %v305_v52  ;;  %v267_v6 = vld [vmem:[%s909_s9 + $0x108] sm:$0xff]  ;;  %v314_v9 = vcombine.high %v306_v63, %v306_v63 }
  0x4d   : > { %638 = vmatpush3.msra.mxu1 %v273_v39  ;;  %604 = vmatprep.subr.mxu0 %v256_v40  ;;  %v269_v60 = vld [vmem:[%s909_s9 + $0x118] sm:$0xff]  ;;  %v250_v7 = vld [vmem:[%s909_s9 + $0x80] sm:$0xff] }
  0x4e   : > { %639 = vmatprep.subr.mxu1 %v288_v41  ;;  %605 = vmatpush3.msra.mxu0 %v240_v44  ;;  %v282_v8 = vld [vmem:[%s909_s9 + $0x180] sm:$0xff]  ;;  %v315_v11 = vcombine.high %v313_v2, %v313_v2  ;;  %v232_v19 = vld [vmem:[#allocation2] sm:$0x3] }
  0x4f   : > { %640 = vmatpush3.msra.mxu1 %v272_v45  ;;  %606 = vmatprep.subr.mxu0 %v255_v46  ;;  %v234_v10 = vld [vmem:[%s909_s9] sm:$0xff] }
  0x50   : > { %641 = vmatprep.subr.mxu1 %v287_v47  ;;  %607 = vmatpush3.msra.mxu0 %v239_v48  ;;  %v266_v12 = vld [vmem:[%s909_s9 + $0x100] sm:$0xff] }
  0x51   : > { %642 = vmatpush3.msra.mxu1 %v271_v49  ;;  %608 = vmatprep.subr.mxu0 %v254_v50 }
  0x52   : > { %643 = vmatprep.subr.mxu1 %v286_v51  ;;  %609 = vmatpush3.msra.mxu0 %v238_v53 }
  0x53   : > { %644 = vmatpush3.msra.mxu1 %v270_v54  ;;  %610 = vmatprep.subr.mxu0 %v253_v56 }
  0x54   : > { %645 = vmatprep.subr.mxu1 %v285_v57  ;;  %611 = vmatpush3.msra.mxu0 %v237_v59 }
  0x55   : > { %646 = vmatpush3.msra.mxu1 %v269_v60  ;;  %612 = vmatprep.subr.mxu0 %v252_v61 }
  0x56   : > { %647 = vmatprep.subr.mxu1 %v284_v62  ;;  %613 = vmatpush3.msra.mxu0 %v236_v0 }
  0x57   : > { %648 = vmatpush3.msra.mxu1 %v268_v1  ;;  %614 = vmatprep.subr.mxu0 %v251_v3 }
  0x58   : > { %649 = vmatprep.subr.mxu1 %v283_v4  ;;  %615 = vmatpush3.msra.mxu0 %v235_v5 }
  0x59   : > { %650 = vmatpush3.msra.mxu1 %v267_v6  ;;  %616 = vmatprep.subr.mxu0 %v250_v7 }
  0x5a   : > { %651 = vmatprep.subr.mxu1 %v282_v8  ;;  %617 = vmatpush3.msra.mxu0 %v234_v10 }
  0x5b   : > { %384 = vmatprep.mubr.f32.mxu0 %v314_v9  ;;  %652 = vmatpush3.msra.mxu1 %v266_v12 }
  0x5c   : > { %454 = vmatprep.mubr.f32.mxu1 %v315_v11  ;;  %385 = vmatmul.mubr.f32.vlgmr.msra.gmra.mxu0 %v306_v63 }
  0x5d   : > { %455 = vmatmul.mubr.f32.vlgmr.msra.gmra.mxu1 %v313_v2 }
 0x11c   : > { %v618_v13 = vpop.f32.mrf.mxu0 }
 0x11d   : > { %v653_v14 = vpop.f32.mrf.mxu1 }
 0x11e   : > { %v619_v15 = vpop.f32.mrf.mxu0 }
 0x11f   : > { %v654_v16 = vpop.f32.mrf.mxu1  ;;  %v620_v17 = vadd.f32 %v619_v15, %v618_v13 }
 0x120   : > { %v655_v18 = vadd.f32 %v654_v16, %v653_v14 }
 0x122   : > { %v457_v20 = vadd.f32 %v655_v18, %v620_v17  ;;  %465 = sbr.rel (%p578_p1) target bundleno = 463 (0x1cf), region = 48 }
 0x124   : > { %v460_v21 = vadd.f32 %v457_v20, %v232_v19 }
 0x126   : > { %461 = vst [vmem:[#allocation2] sm:$0x3] %v460_v21 }
 0x127   : > { %v579_v23 = vld [vmem:[%s1021_s2] ss:$0 sm:$0xff]  ;;  %vm484_vm0 = vcmask 1041408   ;;  %vm496_vm1 = vcmask 0  }
 0x128   : > { %v580_v25 = vld [vmem:[%s1022_s3] ss:$0 sm:$0xff] }
 0x12d   : > { %v466_v22 = vld [vmem:[#allocation2] sm:$0x3] }
 0x12e   : > { %v474_v24 = vadd.f32 %v579_v23, %v466_v22 }
 0x130   : > { %v475_v26 = vmax.f32 %v474_v24, 0.0 }
 0x132   : > { %v483_v27 = vmul.f32 %v580_v25, %v475_v26 }
 0x134   : > { %v485_v28 = vsel %vm484_vm0, %v483_v27, 0.0 }
 0x135   : > { %486 = vadd.xlane.f32.xlu0 %v485_v28 }
 0x1be   : > { %v487_v29 = vpop.xlane.xlu0 %486 }
 0x1bf   : > { %v488_v30 = vsel %vm484_vm0, %v487_v29, 0.0 }
 0x1c0   : > { %v489_v31 = vrot.slane %v488_v30, 4 }
 0x1c2   : > { %v490_v32 = vadd.f32 %v489_v31, %v488_v30 }
 0x1c4   : > { %v491_v33 = vrot.slane %v490_v32, 2 }
 0x1c6   : > { %v492_v34 = vadd.f32 %v491_v33, %v490_v32 }
 0x1c8   : > { %v493_v35 = vrot.slane %v492_v34, 1 }
 0x1ca   : > { %v494_v36 = vadd.f32 %v493_v35, %v492_v34 }
 0x1cc   : > { %v495_v37 = vmul.f32 0.5, %v494_v36 }
 0x1ce   : > { %497 = vst.msk [vmem:[#allocation6] sm:$0x1] %vm496_vm1, %v495_v37 }
 0x1cf PF: > { %p667_p2 = scmp.eq.s32.totalorder %s849_s19, 1  ;;  %s804_s13 = smov [#allocation6]  }
 0x1d0   : > { %s505_s14 = sshll.u32 %s804_s13, 4  ;;  %s506_s14 = int_to_ptr.vmem [resolvable:$true] %s505_s14 }
 0x1d1   : > { %s735_s15 = scalar_lea.vmem %s506_s14, 16  ;;  %s741_s21 = scalar_lea.vmem %s506_s14, 32 }
 0x1d2   : > { %p736_p3 = scmp.ne.s32.totalorder %s506_s14, %s735_s15  ;;  %p742_p6 = scmp.lt.s32.totalorder %s506_s14, %s506_s14 }
 0x1d3   : > { %p743_p10 = scmp.lt.s32.totalorder %s741_s21, %s735_s15 }
 0x1d4   : > { %p737_p4 = pnand %p736_p3, %p667_p2 }
 0x1d5   : > { %p744_p12 = por %p743_p10, %p742_p6 }
 0x1d6   : > { %p738_p5 = pneg %p737_p4 }
 0x1d8   : > { %p745_p11 = pnand %p744_p12, %p738_p5 }
 0x1da   : > { %748 = shalt.err (!%p745_p11)
}
 0x1db   : > { %659 = dma.vmem_to_hbm [thread:$0]  (%p667_p2), %s506_s14, 16, %s1023_s4, [#allocation5]  }
 0x1dc   : > { %780 = dma.done.wait (%p667_p2), [#allocation5], 16  }
 0x1dd   : > { %782 = vsyncadd (%p667_p2), [#allocation5], 4294967280 }
 0x1de PF: > { %p15_p13 = scmp.ge.s32.totalorder %s852_s20, 4   ;;  %s1029_s15 = smov %s789_s16 }
 0x1df   : > { %s1030_s16 = smov %s793_s17  ;;  %s1031_s17 = smov %s862_s23 }
 0x1e0   : > { %s1032_s18 = smov %s852_s20  ;;  %17 = sbr.rel (!%p15_p13) target bundleno = 4 (0x4), region = 84 }
 0x1e5   :  { %518 = vsyncpa [#allocation4], 1 }
 0x1e6   :  { %520 = vsyncpa [#allocation4 + $0x1], 1 }
 0x1e7   :  { %521 = vsyncpa [#allocation5], 1 }
 0x1e8   :  { %523 = vsyncpa [#allocation5 + $0x1], 1 }

</bundles_post_ra>
